<compile_context>
chip_gen: v7x
topology: tpu7x:2x2x1
jax: 0.10.0
libtpu: 0.0.40
codegen_flags: <defaults>
</compile_context>

<pallas_src>
import functools
import math

import jax
import jax.numpy as jnp
from jax.experimental import pallas as pl
from jax.experimental.pallas import tpu as pltpu


def _eca_kernel_size(in_planes, gamma=2, b=1):
    t = int(abs((math.log(in_planes, 2) + b) / gamma))
    return t if t % 2 else t + 1


def _tpu_defaults():
    """(block_bytes_target, vmem_limit_bytes, has_two_tensorcores)."""
    kind = ""
    try:
        dev = jax.devices()[0]
        kind = str(getattr(dev, "device_kind", "") or "").lower()
    except Exception:
        pass
    if "v7" in kind or "7x" in kind:
        # 64 MiB *physical* VMEM per TensorCore (32 MiB scoped default).
        # Peak ~ (2 in + 2 out) double-buffers + in-kernel temps per block.
        return 6 * 1024 * 1024, 56 * 1024 * 1024, True
    if "v6" in kind:
        # 128 MiB physical, 32 MiB scoped default -> raise limit, big blocks.
        return 12 * 1024 * 1024, 104 * 1024 * 1024, False
    if "v5" in kind:
        # 128 MiB physical but only 16 MiB scoped by default -> raise it.  The
        # fused (1.5x-less-HBM-traffic) path matters most on v5e's ~0.8 TB/s.
        return 8 * 1024 * 1024, 96 * 1024 * 1024, False
    # Unknown device (interpret mode / older TPU): stay under the 16 MiB
    # scoped-VMEM default with double-buffered in + out blocks.
    return 2 * 1024 * 1024, None, False


def _cparams(dimension_semantics, vmem_limit_bytes):
    kwargs = dict(dimension_semantics=dimension_semantics)
    if vmem_limit_bytes is not None:
        kwargs["vmem_limit_bytes"] = vmem_limit_bytes
    return pltpu.CompilerParams(**kwargs)


# ----------------------------------------------------------------------------
# In-kernel helpers
# ----------------------------------------------------------------------------
def _conv1d_taps(v, w_ref, K):
    """Zero-padded K-tap cross-correlation along the last (lane) axis.

    v: (R, C) float32 value with channels on lanes; w_ref: (K,) f32 SMEM ref.
    out[r, c] = sum_j w[j] * v[r, c + j - pad]   (zero padding at the edges)
    Runs once per block on a tiny (nb, C) vector (epilogue only).
    """
    R, C = v.shape
    pad = (K - 1) // 2
    if pad == 0:
        return v * w_ref[0]
    z = jnp.zeros((R, pad), dtype=v.dtype)
    vp = jnp.concatenate([z, v, z], axis=-1)            # (R, C + 2*pad)
    out = w_ref[0] * vp[:, 0:C]
    for j in range(1, K):                               # K is small & static
        out = out + w_ref[j] * vp[:, j:j + C]
    return out


# ----------------------------------------------------------------------------
# Kernels
# ----------------------------------------------------------------------------
def _eca_fused_kernel(x_ref, w_ref, o_ref, *, K, inv_hw):
    """Single pass: pool + channel conv + sigmoid + broadcast scale.

    x_ref/o_ref: (nb, C, HW) VMEM;  w_ref: (K,) SMEM.
    No full-tile f32 temporary: sum accumulates in f32, max stays native.
    """
    x = x_ref[...]                                       # native dtype
    avg = jnp.sum(x, axis=-1, dtype=jnp.float32) * inv_hw   # (nb, C) f32
    mx = jnp.max(x, axis=-1).astype(jnp.float32)             # (nb, C) f32
    att = (jax.nn.sigmoid(_conv1d_taps(avg, w_ref, K))
           + jax.nn.sigmoid(_conv1d_taps(mx, w_ref, K)))      # (nb, C) f32
    o_ref[...] = x * att.astype(o_ref.dtype)[:, :, None]


def _eca_pool_kernel(x_ref, w_ref, att_ref, sum_acc, max_acc, *,
                     K, inv_hw, hw_total, ragged_hw):
    """Pass 1: accumulate per-channel sum/max over spatial (HW) tiles, then on
    the last tile run the tiny K-tap conv + sigmoids on the pooled vectors.

    x_ref: (nb, C, thw) VMEM;  att_ref: (nb, C, 1) VMEM out;
    sum_acc/max_acc: (nb, C) f32 VMEM scratch (persist across the HW axis).
    Ragged last spatial tile: pad lanes masked (0 for sum, -inf for max).
    """
    h = pl.program_id(1)

    @pl.when(h == 0)
    def _init():
        sum_acc[...] = jnp.zeros_like(sum_acc)
        max_acc[...] = jnp.full_like(max_acc, -jnp.inf)

    x = x_ref[...]                                       # (nb, C, thw) native
    if ragged_hw:
        thw = x.shape[-1]
        lane = jax.lax.broadcasted_iota(jnp.int32, (1, 1, thw), 2)
        valid = lane < (hw_total - h * thw)              # all-true except last
        x_sum = jnp.where(valid, x, jnp.array(0, x.dtype))
        x_max = jnp.where(valid, x, jnp.array(-jnp.inf, x.dtype))
    else:
        x_sum = x
        x_max = x
    sum_acc[...] += jnp.sum(x_sum, axis=-1, dtype=jnp.float32)
    max_acc[...] = jnp.maximum(max_acc[...],
                               jnp.max(x_max, axis=-1).astype(jnp.float32))

    @pl.when(h == pl.num_programs(1) - 1)
    def _finalize():
        avg = sum_acc[...] * inv_hw
        att = (jax.nn.sigmoid(_conv1d_taps(avg, w_ref, K))
               + jax.nn.sigmoid(_conv1d_taps(max_acc[...], w_ref, K)))
        att_ref[...] = att[:, :, None]


def _eca_scale_kernel(att_ref, x_ref, o_ref):
    """Pass 2: out = att * x, att broadcast over the spatial (lane) axis."""
    o_ref[...] = x_ref[...] * att_ref[...].astype(o_ref.dtype)


# ----------------------------------------------------------------------------
# Wrapper
# ----------------------------------------------------------------------------
def eca_attention(x, conv_w, *, block_bytes_target=None, vmem_limit_bytes=None,
                  force_two_pass=False):
    """x: (N, C, H, W), conv_w: (K,) -> (N, C, H, W)."""
    N, C, H, W = x.shape
    K = int(conv_w.shape[0])
    HW = H * W
    itemsize = jnp.dtype(x.dtype).itemsize
    inv_hw = 1.0 / float(HW)
    x3 = x.reshape(N, C, HW)

    gen_target, gen_limit, two_tc = _tpu_defaults()
    if block_bytes_target is None:
        block_bytes_target = gen_target
    if vmem_limit_bytes is None:
        vmem_limit_bytes = gen_limit

    slab_bytes = C * HW * itemsize

    fused_ok = (not force_two_pass) and slab_bytes <= block_bytes_target
    spatial_budget = block_bytes_target
    if fused_ok and two_tc and N == 1 and HW >= 256 and slab_bytes > 512 * 1024:
        # Batch-1 on a two-TensorCore chip: a single fused grid step would idle
        # one core; take the spatially tiled path so pass 2 shards over HW.
        fused_ok = False
        spatial_budget = max(64 * 1024, slab_bytes // 2)

    # ---------------- fused single-pass path (whole image fits the budget) --
    if fused_ok:
        nb = max(1, min(block_bytes_target // slab_bytes, N))
        if N >= 2:
            nb = min(nb, pl.cdiv(N, 2))    # keep >= 2 parallel grid steps
        grid_n = pl.cdiv(N, nb)            # ragged last batch block is fine
        out = pl.pallas_call(
            functools.partial(_eca_fused_kernel, K=K, inv_hw=inv_hw),
            out_shape=jax.ShapeDtypeStruct((N, C, HW), x.dtype),
            grid=(grid_n,),
            in_specs=[
                pl.BlockSpec((nb, C, HW), lambda n: (n, 0, 0)),
                pl.BlockSpec(memory_space=pltpu.MemorySpace.SMEM),
            ],
            out_specs=pl.BlockSpec((nb, C, HW), lambda n: (n, 0, 0)),
            compiler_params=_cparams(("parallel",), vmem_limit_bytes),
        )(x3, conv_w)
        return out.reshape(N, C, H, W)

    # ---------------- two-pass path (spatially tiled) ------------------------
    if HW >= 128:
        # Largest lane-dense (multiple-of-128) spatial tile inside the budget.
        lane_blocks = max(1, spatial_budget // (C * 128 * itemsize))
        lane_blocks = min(lane_blocks, pl.cdiv(HW, 128))
        thw = 128 * lane_blocks
        if thw >= HW:
            thw = HW                       # single full-extent spatial block
    else:
        thw = HW                           # tiny spatial extent: full block
    nhw = pl.cdiv(HW, thw)
    ragged_hw = (HW % thw) != 0            # last tile has pad lanes to mask

    tile_bytes = C * thw * itemsize
    nb = max(1, min(spatial_budget // tile_bytes, N))
    if N >= 2:
        nb = min(nb, pl.cdiv(N, 2))
    grid_n = pl.cdiv(N, nb)

    # Pass 1: pooled sums/maxes + conv/sigmoid epilogue -> att (N, C, 1) f32.
    att = pl.pallas_call(
        functools.partial(_eca_pool_kernel, K=K, inv_hw=inv_hw,
                          hw_total=HW, ragged_hw=ragged_hw),
        out_shape=jax.ShapeDtypeStruct((N, C, 1), jnp.float32),
        grid=(grid_n, nhw),
        in_specs=[
            pl.BlockSpec((nb, C, thw), lambda n, h: (n, 0, h)),
            pl.BlockSpec(memory_space=pltpu.MemorySpace.SMEM),
        ],
        out_specs=pl.BlockSpec((nb, C, 1), lambda n, h: (n, 0, 0)),
        scratch_shapes=[
            pltpu.VMEM((nb, C), jnp.float32),     # running sum
            pltpu.VMEM((nb, C), jnp.float32),     # running max
        ],
        compiler_params=_cparams(("parallel", "arbitrary"), vmem_limit_bytes),
    )(x3, conv_w)

    # Pass 2: broadcast scale, fully parallel over (batch, HW) tiles.
    out = pl.pallas_call(
        _eca_scale_kernel,
        out_shape=jax.ShapeDtypeStruct((N, C, HW), x.dtype),
        grid=(grid_n, nhw),
        in_specs=[
            pl.BlockSpec((nb, C, 1), lambda n, h: (n, 0, 0)),
            pl.BlockSpec((nb, C, thw), lambda n, h: (n, 0, h)),
        ],
        out_specs=pl.BlockSpec((nb, C, thw), lambda n, h: (n, 0, h)),
        compiler_params=_cparams(("parallel", "parallel"), vmem_limit_bytes),
    )(att, x3)
    return out.reshape(N, C, H, W)


# ----------------------------------------------------------------------------
# Pure-JAX reference (mirrors the PyTorch forward)
# ----------------------------------------------------------------------------
def eca_attention_ref(x, conv_w):
    N, C, H, W = x.shape
    K = conv_w.shape[0]
    pad = (K - 1) // 2
    avg = x.mean(axis=(2, 3))      # (N, C)
    mx = x.max(axis=(2, 3))        # (N, C)

    def conv1d(v):                 # zero-padded cross-correlation over C
        vp = jnp.pad(v, ((0, 0), (pad, pad)))
        return sum(conv_w[j] * vp[:, j:j + C] for j in range(K))

    att = jax.nn.sigmoid(conv1d(avg)) + jax.nn.sigmoid(conv1d(mx))
    return att[:, :, None, None] * x


if __name__ == "__main__":
    def run_case(case, N, C, H, W, dtype=jnp.float32, atol=1e-5, rtol=1e-5,
                 **kwargs):
        K = _eca_kernel_size(C)
        key = jax.random.fold_in(jax.random.PRNGKey(0), case)
        kx, kw = jax.random.split(key)
        x = jax.random.normal(kx, (N, C, H, W), dtype=jnp.float32).astype(dtype)
        bound = 1.0 / math.sqrt(K)   # stand-in for nn.Conv1d(1,1,k) weight init
        conv_w = jax.random.uniform(kw, (K,), dtype=jnp.float32,
                                    minval=-bound, maxval=bound)
        out = jax.block_until_ready(eca_attention(x, conv_w, **kwargs))
        ref = eca_attention_ref(x.astype(jnp.float32), conv_w)
        assert out.shape == (N, C, H, W)
        assert jnp.allclose(out.astype(jnp.float32), ref,
                            atol=atol, rtol=rtol), (case, N, C, H, W)

    # 1) Fused single-pass; HW = 256 is a multiple of 128 (lane-dense).
    run_case(0, 2, 16, 16, 16)
    # 2) Fused path with HW % 128 != 0 (masked lane reduce/stores).
    run_case(1, 2, 32, 7, 7)
    # 3) Fused with a ragged last batch block (cdiv grid: N=3, nb=2).
    run_case(2, 3, 16, 16, 16)
    # 4) Two-pass path: spatially tiled pooling accumulator + parallel scale.
    run_case(3, 2, 16, 16, 16, force_two_pass=True,
             block_bytes_target=8 * 1024)
    # 5) Two-pass with a ragged last spatial tile (HW % 128 != 0): pad-lane
    #    masking in the pooling pass (0 for sum, -inf for max).
    run_case(4, 2, 64, 13, 13, force_two_pass=True,
             block_bytes_target=32 * 1024)
    # 6) bf16 input exercises the native-dtype reduce / scale path.
    run_case(5, 2, 16, 16, 16, dtype=jnp.bfloat16, atol=0.05, rtol=0.05)

    print("KERNEL_OK")
</pallas_src>

<mosaic_0001>
module attributes {stable_mosaic.version = 11 : i64} {
  func.func @_eca_fused_kernel(%arg0: i32, %arg1: memref<1x16x256xf32, #tpu.memory_space<vmem>>, %arg2: memref<3xf32, #tpu.memory_space<smem>>, %arg3: memref<1x16x256xf32, #tpu.memory_space<vmem>>) attributes {dimension_semantics = [#tpu.dimension_semantics<parallel>], iteration_bounds = array<i64: 2>, scalar_prefetch = 0 : i64, scratch_operands = 0 : i64, tpu.core_type = #tpu.core_type<tc>, window_params = [{transform_indices = @transform_0, window_bounds = array<i64: 1, 16, 256>}, {transform_indices = @transform_1, window_bounds = array<i64: 3>}, {transform_indices = @transform_2, window_bounds = array<i64: 1, 16, 256>}]} {
    %c0 = arith.constant 0 : index
    %c0_0 = arith.constant 0 : index
    %c0_1 = arith.constant 0 : index
    %0 = vector.load %arg1[%c0, %c0_0, %c0_1] : memref<1x16x256xf32, #tpu.memory_space<vmem>>, vector<1x16x256xf32>
    %cst = arith.constant dense<0.000000e+00> : vector<1x16xf32>
    %1 = vector.multi_reduction <add>, %0, %cst [2] : vector<1x16x256xf32> to vector<1x16xf32>
    %cst_2 = arith.constant 3.906250e-03 : f32
    %2 = vector.broadcast %cst_2 : f32 to vector<1x16xf32>
    %3 = arith.mulf %1, %2 : vector<1x16xf32>
    %cst_3 = arith.constant dense<0xFF800000> : vector<1x16xf32>
    %4 = vector.multi_reduction <maximumf>, %0, %cst_3 [2] : vector<1x16x256xf32> to vector<1x16xf32>
    %cst_4 = arith.constant 0.000000e+00 : f32
    %5 = vector.broadcast %cst_4 : f32 to vector<1x1xf32>
    %6 = tpu.concatenate %5, %3, %5 in 1 : vector<1x1xf32>, vector<1x16xf32>, vector<1x1xf32> -> vector<1x18xf32>
    %c0_5 = arith.constant 0 : index
    %7 = memref.load %arg2[%c0_5] : memref<3xf32, #tpu.memory_space<smem>>
    %8 = vector.extract_strided_slice %6 {offsets = [0, 0], sizes = [1, 16], strides = [1, 1]} : vector<1x18xf32> to vector<1x16xf32>
    %9 = vector.broadcast %7 : f32 to vector<1x16xf32>
    %10 = arith.mulf %9, %8 : vector<1x16xf32>
    %c1 = arith.constant 1 : index
    %11 = memref.load %arg2[%c1] : memref<3xf32, #tpu.memory_space<smem>>
    %12 = vector.extract_strided_slice %6 {offsets = [0, 1], sizes = [1, 16], strides = [1, 1]} : vector<1x18xf32> to vector<1x16xf32>
    %13 = vector.broadcast %11 : f32 to vector<1x16xf32>
    %14 = arith.mulf %13, %12 : vector<1x16xf32>
    %15 = arith.addf %10, %14 : vector<1x16xf32>
    %c2 = arith.constant 2 : index
    %16 = memref.load %arg2[%c2] : memref<3xf32, #tpu.memory_space<smem>>
    %17 = vector.extract_strided_slice %6 {offsets = [0, 2], sizes = [1, 16], strides = [1, 1]} : vector<1x18xf32> to vector<1x16xf32>
    %18 = vector.broadcast %16 : f32 to vector<1x16xf32>
    %19 = arith.mulf %18, %17 : vector<1x16xf32>
    %20 = arith.addf %15, %19 : vector<1x16xf32>
    %21 = arith.negf %20 : vector<1x16xf32>
    %22 = math.exp %21 : vector<1x16xf32>
    %cst_6 = arith.constant 1.000000e+00 : f32
    %23 = vector.broadcast %cst_6 : f32 to vector<1x16xf32>
    %24 = arith.addf %23, %22 : vector<1x16xf32>
    %25 = arith.divf %23, %24 : vector<1x16xf32>
    %cst_7 = arith.constant 0.000000e+00 : f32
    %26 = vector.broadcast %cst_7 : f32 to vector<1x1xf32>
    %27 = tpu.concatenate %26, %4, %26 in 1 : vector<1x1xf32>, vector<1x16xf32>, vector<1x1xf32> -> vector<1x18xf32>
    %c0_8 = arith.constant 0 : index
    %28 = memref.load %arg2[%c0_8] : memref<3xf32, #tpu.memory_space<smem>>
    %29 = vector.extract_strided_slice %27 {offsets = [0, 0], sizes = [1, 16], strides = [1, 1]} : vector<1x18xf32> to vector<1x16xf32>
    %30 = vector.broadcast %28 : f32 to vector<1x16xf32>
    %31 = arith.mulf %30, %29 : vector<1x16xf32>
    %c1_9 = arith.constant 1 : index
    %32 = memref.load %arg2[%c1_9] : memref<3xf32, #tpu.memory_space<smem>>
    %33 = vector.extract_strided_slice %27 {offsets = [0, 1], sizes = [1, 16], strides = [1, 1]} : vector<1x18xf32> to vector<1x16xf32>
    %34 = vector.broadcast %32 : f32 to vector<1x16xf32>
    %35 = arith.mulf %34, %33 : vector<1x16xf32>
    %36 = arith.addf %31, %35 : vector<1x16xf32>
    %c2_10 = arith.constant 2 : index
    %37 = memref.load %arg2[%c2_10] : memref<3xf32, #tpu.memory_space<smem>>
    %38 = vector.extract_strided_slice %27 {offsets = [0, 2], sizes = [1, 16], strides = [1, 1]} : vector<1x18xf32> to vector<1x16xf32>
    %39 = vector.broadcast %37 : f32 to vector<1x16xf32>
    %40 = arith.mulf %39, %38 : vector<1x16xf32>
    %41 = arith.addf %36, %40 : vector<1x16xf32>
    %42 = arith.negf %41 : vector<1x16xf32>
    %43 = math.exp %42 : vector<1x16xf32>
    %cst_11 = arith.constant 1.000000e+00 : f32
    %44 = vector.broadcast %cst_11 : f32 to vector<1x16xf32>
    %45 = arith.addf %44, %43 : vector<1x16xf32>
    %46 = arith.divf %44, %45 : vector<1x16xf32>
    %47 = arith.addf %25, %46 : vector<1x16xf32>
    %48 = vector.shape_cast %47 : vector<1x16xf32> to vector<1x16x1xf32>
    %49 = vector.broadcast %48 : vector<1x16x1xf32> to vector<1x16x256xf32>
    %50 = arith.mulf %0, %49 : vector<1x16x256xf32>
    %c0_12 = arith.constant 0 : index
    %c0_13 = arith.constant 0 : index
    %c0_14 = arith.constant 0 : index
    %51 = vector.load %arg3[%c0_12, %c0_13, %c0_14] : memref<1x16x256xf32, #tpu.memory_space<vmem>>, vector<1x16x256xf32>
    tpu.vector_store %arg3[%c0_12, %c0_13, %c0_14], %50 {strides = array<i32>} : memref<1x16x256xf32, #tpu.memory_space<vmem>>, vector<1x16x256xf32>,
    return
  }
  func.func @transform_0(%arg0: i32) -> (i32, i32, i32) {
    %c0_i32 = arith.constant 0 : i32
    %c0_i32_0 = arith.constant 0 : i32
    %c0_i32_1 = arith.constant 0 : i32
    return %arg0, %c0_i32, %c0_i32_0 : i32, i32, i32
  }
  func.func @transform_1(%arg0: i32) -> i32 {
    %c0_i32 = arith.constant 0 : i32
    %c0_i32_0 = arith.constant 0 : i32
    return %c0_i32 : i32
  }
  func.func @transform_2(%arg0: i32) -> (i32, i32, i32) {
    %c0_i32 = arith.constant 0 : i32
    %c0_i32_0 = arith.constant 0 : i32
    %c0_i32_1 = arith.constant 0 : i32
    return %arg0, %c0_i32, %c0_i32_0 : i32, i32, i32
  }
}

</mosaic_0001>

<bundles_post_ra>
// kernel: tpu_custom_call.1
= control target key start
LH: loop header
LB: loop body
LE: loop exit
PB: predicated region body
PF: predicated region fallthrough
CT: control target
= control target key end

     0   :  { %7 = vsyncpa [#allocation3], 0  ;;  %s844_s0 = inlined_call_operand.hbm [shape: f32[2,16,256], index: 0, kind: input, shape index: {}]   ;;  %s845_s1 = inlined_call_operand.vmem [shape: f32[3], index: 1, kind: input, shape index: {}]   ;;  %s846_s2 = inlined_call_operand.hbm [shape: f32[2,16,256], index: 2, kind: output, shape index: {}]  }
   0x1   :  { %9 = vsyncpa [#allocation3 + $0x1], 0 }
   0x2   :  { %10 = vsyncpa [#allocation5], 0 }
   0x3   :  { %11 = vsyncpa [#allocation4], 0 }
   0x4   :  { %13 = vsyncpa [#allocation4 + $0x1], 0  ;;  %s626_s9 = smov 0   ;;  %s628_s10 = smov 0  }
   0x5   :  { %s630_s11 = smov 0   ;;  %s632_s12 = smov 0  }
   0x6 LB: > { %s647_s13 = sadd.s32 4294967295, %s600_s12   ;;  %s392_s14 = sadd.s32 4294967294, %s600_s12   ;;  %s600_s12 = sphi %s632_s12, %s866_s12   ;;  %s596_s11 = sphi %s630_s11, %s865_s11   ;;  %s592_s10 = sphi %s628_s10, %s864_s10   ;;  %s588_s9 = sphi %s626_s9, %s863_s9  }
   0x7   : > { %s651_s15 = sadd.s32 1, %s600_s12   ;;  %s26_s16 = sadd.s32 1, %s596_s11 }
   0x8   : > { %s23_s17 = ssub.s32 %s600_s12, %s651_s15  ;;  %p33_p0 = scmp.ne.s32.totalorder %s596_s11, %s592_s10 }
   0x9   : > { %p24_p1 = scmp.eq.s32.totalorder %s23_s17, 0  ;;  %p34_p2 = scmp.eq.s32.totalorder %s600_s12, 0 }
   0xa   : > { %p39_p3 = scmp.ne.s32.totalorder %s592_s10, %s588_s9  ;;  %p848_p4 = scmp.eq.s32.totalorder %s647_s13, 0 }
   0xb   : > { %s663_s18 = scalar_select %p24_p1, %s596_s11, %s26_s16  }
   0xc   : > { %p665_p5 = por %p34_p2, %p33_p0  ;;  %p671_p6 = por %p848_p4, %p39_p3 }
   0xd   : > { %p84_p7 = scmp.eq.s32.totalorder %s647_s13, 1  ;;  %p90_p8 = scmp.eq.s32.totalorder %s392_s14, 1 }
   0xe   : > { %s851_s20 = scalar_select %p671_p6, 1, 0 }
   0xf   : > { %p393_p9 = scmp.ge.s32.totalorder %s600_s12, 1  ;;  %p97_p10 = scmp.lt.s32.totalorder %s600_s12, 3 }
  0x10   : > { %p678_p11 = por %p84_p7, %p33_p0  ;;  %p682_p12 = por %p90_p8, %p39_p3 }
  0x11   : > { %p686_p13 = pnand %p393_p9, %p97_p10  ;;  %s110_s26 = sshll.u32 %s845_s1, 4  ;;  %s111_s26 = int_to_ptr.vmem [resolvable:$true] %s110_s26 }
  0x12   : > { %s852_s21 = scalar_select %p678_p11, 1, 0 }
  0x13   : > { %s853_s22 = scalar_select %p682_p12, 1, 0 }
  0x14   : > { %p422_p1 = pneg %p686_p13  ;;  %p435_p2 = scmp.lt.s32.totalorder %s600_s12, 2 }
  0x15   : > { %s121_s28 = sand.u32 1, %s596_s11   ;;  %s485_s3 = scalar_lea.vmem %s111_s26, 16 }
  0x16   : > { %p699_p7 = pnand %p422_p1, %p848_p4  ;;  %p706_p3 = pnand %p435_p2, %p665_p5 }
  0x17   : > { %s396_s30 = sshll.u32 %s121_s28, 5  ;;  %p486_p8 = scmp.ne.s32.totalorder %s111_s26, %s485_s3 }
  0x18   : > { %p487_p9 = pneg %p699_p7  ;;  %p493_p12 = scmp.lt.s32.totalorder %s111_s26, %s111_s26 }
  0x19   : > { %p494_p11 = scmp.lt.s32.totalorder %s485_s3, %s485_s3 }
  0x1a   : > { %p488_p10 = pnand %p487_p9, %p486_p8 }
  0x1b   : > { %p495_p1 = por %p494_p11, %p493_p12 }
  0x1c   : > { %p489_p0 = pneg %p488_p10 }
  0x1e   : > { %p496_p4 = pnand %p495_p1, %p489_p0 }
  0x20   : > { %499 = shalt.err (!%p496_p4)
}
  0x21   : > { %s602_s4 = smov [#allocation6]   ;;  %s412_s5 = sshll.u32 %s600_s12, 9 }
  0x22   : > { %425 = dma.vmem_to_smem (!%p699_p7), %s111_s26, 16, %s602_s4, [#allocation5]  }
  0x23   : > { %s125_s6 = scalar_lea.vmem [#allocation2], %s396_s30  ;;  %s718_s16 = scalar_lea.hbm %s844_s0, %s412_s5 }
  0x24   : > { %s132_s7 = sshll.u32 %s125_s6, 4  ;;  %s722_s17 = scalar_lea.sflag [#allocation3], %s121_s28  ;;  %s720_s7 = int_to_ptr.vmem [resolvable:$true] %s132_s7 }
  0x25   : > { %s500_s19 = scalar_lea.hbm %s718_s16, 512  ;;  %p502_p5 = pneg %p706_p3 }
  0x26   : > { %p501_p4 = scmp.ne.s32.totalorder %s718_s16, %s500_s19  ;;  %s505_s26 = scalar_lea.hbm %s844_s0, 1024 }
  0x27   : > { %p506_p0 = scmp.lt.u32.totalorder %s718_s16, %s844_s0  ;;  %p507_p2 = scmp.lt.u32.totalorder %s505_s26, %s500_s19 }
  0x28   : > { %p503_p11 = pnand %p502_p5, %p501_p4  ;;  %p509_p8 = scmp.lt.u32.totalorder %s500_s19, %s718_s16 }
  0x29   : > { %p508_p7 = por %p507_p2, %p506_p0 }
  0x2a   : > { %p504_p12 = pneg %p503_p11 }
  0x2b   : > { %p510_p9 = por %p509_p8, %p508_p7 }
  0x2d   : > { %p511_p10 = pnand %p510_p9, %p504_p12 }
  0x2f   : > { %514 = shalt.err (!%p511_p10)
}
  0x30   : > { %s515_s28 = scalar_lea.vmem %s720_s7, 512  ;;  %s603_s3 = smov [#allocation2]  }
  0x31   : > { %p516_p1 = scmp.ne.s32.totalorder %s720_s7, %s515_s28  ;;  %s520_s4 = sshll.u32 %s603_s3, 4  ;;  %s521_s4 = int_to_ptr.vmem [resolvable:$false] %s520_s4 }
  0x32   : > { %s522_s5 = scalar_lea.vmem %s521_s4, 1024  ;;  %p523_p6 = scmp.lt.s32.totalorder %s720_s7, %s521_s4 }
  0x33   : > { %p518_p4 = pnand %p516_p1, %p502_p5  ;;  %p524_p0 = scmp.lt.s32.totalorder %s522_s5, %s515_s28 }
  0x35   : > { %p519_p11 = pneg %p518_p4  ;;  %p525_p2 = por %p524_p0, %p523_p6 }
  0x37   : > { %p526_p7 = pnand %p525_p2, %p519_p11 }
  0x39   : > { %529 = shalt.err (!%p526_p7)
}
  0x3a   : > { %s604_s6 = smov 256   ;;  %s605_s8 = smov 16  }
  0x3b   : > { %429 = dma.hbm_to_vmem [thread:$0]  (!%p706_p3), %s718_s16, 512, %s720_s7, %s722_s17, %s604_s6, %s604_s6, %s605_s8  }
  0x3c   : > { %144 = sbr.rel (%p686_p13) target bundleno = 518 (0x206), region = 28  ;;  %s753_s14 = sand.u32 (!%p686_p13), 1, %s592_s10  }
  0x3d   : > { %s400_s19 = sshll.u32 (!%p686_p13), %s753_s14, 5  ;;  %s147_s24 = scalar_lea.sflag (!%p686_p13), [#allocation3], %s753_s14 }
  0x3e   : > { %s150_s25 = scalar_lea.vmem (!%p686_p13), [#allocation2], %s400_s19  ;;  %p857_p6 = scmp.ne.s32.totalorder (!%p686_p13), %s851_s20, 0 }
  0x43   : > { %575 = dma.done.wait (%p857_p6), %s147_s24, 512  }
  0x44   : > { %577 = vsyncadd (%p857_p6), %s147_s24, 4294966784  ;;  %p858_p3 = scmp.eq.s32.totalorder %s647_s13, 0 }
  0x46   : > { %579 = dma.done.wait (%p858_p3), [#allocation5], 16   ;;  %p859_p13 = pmov %p858_p3 }
  0x48   : > { %581 = vsyncadd (%p859_p13), [#allocation5], 4294967280 }
  0x49   : > { %159 = sfence }
  0x4a   : > { %v767_v0 = vld [vmem:[%s150_s25] sm:$0xff]  ;;  %v769_v1 = vld [vmem:[%s150_s25 + $0x8] sm:$0xff]  ;;  %v771_v2 = vld [vmem:[%s150_s25 + $0x10] sm:$0xff]  ;;  %v196_v8 = vlaneseq  ;;  %s403_s20 = sld [smem:[#allocation6 + $0x1]]  ;;  %vm208_vm0 = vcmask 138312   ;;  %vm211_vm1 = vcmask 7168  }
  0x4b   : > { %v188_v3 = vmax.f32 %v767_v0, %v769_v1  ;;  %v180_v4 = vadd.f32 %v769_v1, %v767_v0  ;;  %v777_v5 = vld [vmem:[%s150_s25 + $0x18] sm:$0xff]  ;;  %s404_s23 = sld [smem:[#allocation6 + $0x2]]  ;;  %vm213_vm2 = vcmask 138240   ;;  %s606_s29 = smov 127  }
  0x4c   : > { %v191_v6 = vmax.f32 %v771_v2, %v777_v5  ;;  %v183_v7 = vadd.f32 %v777_v5, %v771_v2  ;;  %v197_v9 = vand.u32 127, %v196_v8  ;;  %v783_v11 = vshrl.u32 %v196_v8, 7  ;;  %s607_s7 = smov 126   ;;  %s215_s16 = sld [smem:[#allocation6]] }
  0x4d   : > { %189 = vmax.xlane.f32.xlu1 %v188_v3  ;;  %181 = vadd.xlane.f32.xlu0 %v180_v4  ;;  %s175_s17 = scalar_lea.vmem [#allocation7], %s400_s19  ;;  %s413_s27 = sshll.u32 %s647_s13, 9 }
  0x4e   : > { %v198_v10 = vadd.s32 4294967295, %v197_v9  ;;  %v203_v12 = vadd.s32 4294967287, %v197_v9  ;;  %v276_v55 = vsub.s32 0, %v783_v11  ;;  %s307_s26 = sshll.u32 %s175_s17, 4  ;;  %s796_s3 = scalar_lea.hbm %s846_s2, %s413_s27  ;;  %s791_s26 = int_to_ptr.vmem [resolvable:$true] %s307_s26 }
  0x4f   : > { %s294_s13 = scalar_lea.sflag [#allocation4], %s753_s14  ;;  %s530_s4 = scalar_lea.vmem %s791_s26, 512 }
  0x50   : > { %v201_v15 = vsub.s32 %v198_v10, %v783_v11  ;;  %v206_v16 = vsub.s32 %v203_v12, %v783_v11  ;;  %v219_v26 = vstv %s403_s20  ;;  %p531_p5 = scmp.ne.s32.totalorder %s791_s26, %s530_s4  ;;  %p860_p12 = scmp.ne.s32.totalorder %s852_s21, 0 }
  0x51   : > { %192 = vmax.xlane.f32.xlu1 %v191_v6  ;;  %184 = vadd.xlane.f32.xlu0 %v183_v7  ;;  %v227_v34 = vstv %s404_s23  ;;  %s608_s5 = smov [#allocation7]  }
  0x52   : > { %v216_v37 = vstv %s215_s16  ;;  %p532_p8 = pnand %p531_p5, %p860_p12  ;;  %s534_s6 = sshll.u32 %s608_s5, 4  ;;  %s535_s6 = int_to_ptr.vmem [resolvable:$false] %s534_s6 }
  0x53   : > { %s536_s8 = scalar_lea.vmem %s535_s6, 1024  ;;  %p537_p10 = scmp.lt.s32.totalorder %s791_s26, %s535_s6 }
  0x54   : > { %p533_p9 = pneg %p532_p8  ;;  %p538_p1 = scmp.lt.s32.totalorder %s536_s8, %s530_s4 }
  0x56   : > { %p539_p4 = por %p538_p1, %p537_p10 }
  0x58   : > { %p540_p11 = pnand %p539_p4, %p533_p9 }
  0xda   : > { %v190_v13 = vpop.xlane.xlu1 %189  ;;  %v182_v14 = vpop.xlane.xlu0 %181 }
  0xdb   : > { %v186_v17 = vmul.f32 0.00390625, %v182_v14  ;;  %v245_v20 = vrot.slane %v190_v13, %v201_v15 }
  0xdd   : > { %v202_v23 = vrot.slane %v186_v17, %v201_v15 }
  0xde   : > { %v193_v18 = vpop.xlane.xlu1 %192  ;;  %v185_v19 = vpop.xlane.xlu0 %184 }
  0xdf   : > { %v249_v21 = vrot.slane %v193_v18, %v206_v16  ;;  %v187_v22 = vmul.f32 0.00390625, %v185_v19 }
  0xe1   : > { %v250_v24 = vsel %vm208_vm0, %v249_v21, %v245_v20  ;;  %v207_v25 = vrot.slane %v187_v22, %v206_v16 }
  0xe2   : > { %v252_v27 = vsel %vm211_vm1, 0.0, %v250_v24 }
  0xe3   : > { %v209_v28 = vsel %vm208_vm0, %v207_v25, %v202_v23  ;;  %v253_v29 = vsel %vm213_vm2, %v252_v27, 0.0 }
  0xe4   : > { %v255_v30 = vmul.f32 %v253_v29, %v219_v26  ;;  %v212_v31 = vsel %vm211_vm1, 0.0, %v209_v28  ;;  %v261_v36 = vmul.f32 %v253_v29, %v227_v34  ;;  %v254_v43 = vmul.f32 %v253_v29, %v216_v37 }
  0xe5   : > { %v214_v32 = vsel %vm213_vm2, %v212_v31, 0.0 }
  0xe6   : > { %257 = vrot.lane.b32.xlu1 %v255_v30, %s606_s29  ;;  %v220_v33 = vmul.f32 %v219_v26, %v214_v32  ;;  %v228_v35 = vmul.f32 %v227_v34, %v214_v32  ;;  %v217_v39 = vmul.f32 %v216_v37, %v214_v32 }
  0xe8   : > { %222 = vrot.lane.b32.xlu0 %v220_v33, %s606_s29 }
  0xea   : > { %230 = vrot.lane.b32.xlu1 %v228_v35, %s607_s7 }
  0xee   : > { %263 = vrot.lane.b32.xlu1 %v261_v36, %s607_s7 }
 0x158   : > { %v258_v38 = vpop.permute.xlu1 %257 }
 0x159   : > { %v260_v45 = vadd.f32 %v258_v38, %v254_v43 }
 0x15a   : > { %v223_v40 = vpop.permute.xlu0 %222 }
 0x15b   : > { %v225_v41 = vadd.f32 %v223_v40, %v217_v39 }
 0x15c   : > { %v231_v42 = vpop.permute.xlu1 %230 }
 0x15d   : > { %v233_v44 = vadd.f32 %v231_v42, %v225_v41 }
 0x15f   : > { %v405_v46 = vmul.f32 -1.442695, %v233_v44 }
 0x160   : > { %v264_v47 = vpop.permute.xlu1 %263 }
 0x161   : > { %477 = vpow2.f32 %v405_v46  ;;  %v266_v48 = vadd.f32 %v264_v47, %v260_v45 }
 0x163   : > { %v406_v49 = vmul.f32 -1.442695, %v266_v48 }
 0x165   : > { %479 = vpow2.f32 %v406_v49 }
 0x16b   : > { %v478_v50 = vpop.eup %477 }
 0x16c   : > { %v237_v51 = vadd.f32 1.0, %v478_v50 }
 0x16e   : > { %481 = vrcp.f32 %v237_v51 }
 0x16f   : > { %v480_v52 = vpop.eup %479 }
 0x170   : > { %v270_v53 = vadd.f32 1.0, %v480_v52 }
 0x172   : > { %483 = vrcp.f32 %v270_v53 }
 0x178   : > { %v482_v54 = vpop.eup %481 }
 0x17c   : > { %v484_v56 = vpop.eup %483 }
 0x17d   : > { %v273_v57 = vadd.f32 %v484_v56, %v482_v54 }
 0x17f   : > { %v277_v58 = vrot.slane %v273_v57, %v276_v55 }
 0x181   : > { %283 = vbcast.lane.b32.xlu1 %v277_v58, 264  ;;  %279 = vbcast.lane.b32.xlu0 %v277_v58, 256 }
 0x1f3   : > { %v284_v59 = vpop.permute.xlu1 %283  ;;  %v280_v60 = vpop.permute.xlu0 %279 }
 0x1f4   : > { %v287_v61 = vmul.f32 %v284_v59, %v771_v2  ;;  %v288_v62 = vmul.f32 %v284_v59, %v777_v5  ;;  %v285_v63 = vmul.f32 %v280_v60, %v767_v0  ;;  %v286_v3 = vmul.f32 %v280_v60, %v769_v1 }
 0x1f6   : > { %291 = vst [vmem:[%s175_s17 + $0x10] sm:$0xff] %v287_v61  ;;  %292 = vst [vmem:[%s175_s17 + $0x18] sm:$0xff] %v288_v62 }
 0x1f7   : > { %289 = vst [vmem:[%s175_s17] sm:$0xff] %v285_v63  ;;  %290 = vst [vmem:[%s175_s17 + $0x8] sm:$0xff] %v286_v3 }
 0x1f8   : > { %543 = shalt.err (!%p540_p11)
}
 0x1f9   : > { %s544_s19 = scalar_lea.hbm %s796_s3, 512  ;;  %s548_s20 = scalar_lea.hbm %s846_s2, 1024 }
 0x1fa   : > { %p545_p0 = scmp.ne.s32.totalorder %s796_s3, %s544_s19  ;;  %p549_p6 = scmp.lt.u32.totalorder %s796_s3, %s846_s2 }
 0x1fb   : > { %p550_p3 = scmp.lt.u32.totalorder %s548_s20, %s544_s19  ;;  %p552_p5 = scmp.lt.u32.totalorder %s544_s19, %s796_s3 }
 0x1fc   : > { %p546_p2 = pnand %p545_p0, %p860_p12 }
 0x1fd   : > { %p551_p13 = por %p550_p3, %p549_p6 }
 0x1fe   : > { %p547_p7 = pneg %p546_p2 }
 0x1ff   : > { %p553_p8 = por %p552_p5, %p551_p13 }
 0x201   : > { %p554_p9 = pnand %p553_p8, %p547_p7 }
 0x203   : > { %557 = shalt.err (!%p554_p9)
}
 0x204   : > { %s609_s7 = smov 256   ;;  %s610_s16 = smov 16  }
 0x205   : > { %420 = dma.vmem_to_hbm [thread:$0]  (%p860_p12), %s791_s26, 512, %s796_s3, %s294_s13, %s609_s7, %s609_s7, %s610_s16  }
 0x206 PF: > { %s322_s17 = sand.u32 1, %s588_s9   ;;  %p861_p10 = scmp.ne.s32.totalorder %s853_s22, 0 }
 0x207   : > { %p862_p1 = scmp.ge.s32.totalorder %s600_s12, 2  ;;  %s323_s27 = scalar_lea.sflag [#allocation4], %s322_s17 }
 0x209   : > { %p431_p4 = pnand %p862_p1, %p861_p10 }
 0x20b   : > { %583 = dma.done.wait (!%p431_p4), %s323_s27, 512  }
 0x20c   : > { %585 = vsyncadd (!%p431_p4), %s323_s27, 4294966784  ;;  %p16_p11 = scmp.ge.s32.totalorder %s651_s15, 4   ;;  %s863_s9 = smov %s592_s10 }
 0x20d   : > { %s864_s10 = smov %s596_s11  ;;  %s865_s11 = smov %s663_s18 }
 0x20e   : > { %s866_s12 = smov %s651_s15  ;;  %18 = sbr.rel (!%p16_p11) target bundleno = 6 (0x6), region = 78 }
 0x215   :  { %328 = vsyncpa [#allocation3], 1 }
 0x216   :  { %330 = vsyncpa [#allocation3 + $0x1], 1 }
 0x217   :  { %331 = vsyncpa [#allocation4], 1 }
 0x218   :  { %333 = vsyncpa [#allocation4 + $0x1], 1 }
 0x219   :  { %334 = vsyncpa [#allocation5], 1 }
 0x21a   :  { %336 = vsyncpa [#allocation5 + $0x1], 1 }

</bundles_post_ra>
